<compile_context>
chip_gen: v6e
topology: v6e:2x2x1
jax: 0.10.0
libtpu: 0.0.40
codegen_flags: <defaults>
</compile_context>

<pallas_src>
import functools

import jax
import jax.numpy as jnp
from jax.experimental import pallas as pl
from jax.experimental.pallas import tpu as pltpu


def _flat_index(shape):
    """int32 array of `shape` holding each element's flattened (row-major) index."""
    flat = None
    mul = 1
    for ax in range(len(shape) - 1, -1, -1):
        if shape[ax] != 1:
            term = jax.lax.broadcasted_iota(jnp.int32, shape, ax) * mul
            flat = term if flat is None else flat + term
        mul *= shape[ax]
    if flat is None:
        flat = jnp.zeros(shape, jnp.int32)
    return flat


def _ce2d_kernel(logits_ref, tgt_ref, out_ref, *, n_valid, pix_per_block,
                 needs_mask):
    # logits block: (1, C, TR, 128) [dense path] or (1, C, TILE_S) [fallback]
    # target block: (1, 1, TR, 128)               or (1, 1, TILE_S)
    x = logits_ref[0].astype(jnp.float32)          # class axis leading
    t = tgt_ref[0]                                 # (1, ...) int32

    # log-softmax over the class (leading) axis: in the dense path these are
    # plain VALU max/adds across C fully-dense (TR, 128) slabs.
    m = jnp.max(x, axis=0, keepdims=True)
    lse = jnp.log(jnp.sum(jnp.exp(x - m), axis=0, keepdims=True)) + m

    # gather the target-class logit via a one-hot select along the class axis
    cls = jax.lax.broadcasted_iota(jnp.int32, x.shape, 0)
    tgt_logit = jnp.sum(jnp.where(cls == t, x, 0.0), axis=0, keepdims=True)

    nll = lse - tgt_logit                          # -log p[target], per pixel

    s_idx = pl.program_id(1)
    if needs_mask:
        last = pl.num_programs(1) - 1

        # full tiles pay no mask cost at all
        @pl.when(s_idx < last)
        def _():
            out_ref[...] = jnp.sum(nll).reshape((1, 1, 1, 1))

        # only the last (partial) tile pays for the ragged-tail mask
        @pl.when(s_idx == last)
        def _():
            pix = s_idx * pix_per_block + _flat_index(nll.shape)
            masked = jnp.where(pix < n_valid, nll, 0.0)
            out_ref[...] = jnp.sum(masked).reshape((1, 1, 1, 1))
    else:
        out_ref[...] = jnp.sum(nll).reshape((1, 1, 1, 1))


def _default_block_bytes():
    # Bigger per-step blocks amortize the ~0.35us/step grid overhead.  v7x
    # (the <=64 MiB-VMEM, 3.2 TB/s-HBM generation) wants ~8 MiB blocks;
    # v5e/v6e are fine around 3 MiB.
    try:
        vmem = pltpu.get_tpu_info().vmem_capacity_bytes
        return 8 * 1024 * 1024 if vmem <= 80 * 1024 * 1024 else 3 * 1024 * 1024
    except Exception:
        return 4 * 1024 * 1024


def cross_entropy_loss_2d(outputs, targets, *, block_bytes=None):
    """outputs: (N, C, H, W) float logits; targets: (N, H, W) (or (1,1,H,W)) int.
    Returns scalar mean cross-entropy == NLLLoss2d(log_softmax(outputs), targets)."""
    # TODO(synk): per-class `weight=` and `ignore_index` of NLLLoss2d are not
    # implemented (weight=None path only; targets assumed in [0, C)).
    N, C, H, W = outputs.shape
    if targets.ndim == 4 and targets.shape[0] == 1:
        targets = targets.reshape(1, targets.shape[2], targets.shape[3])

    S = H * W
    itemsize = jnp.dtype(outputs.dtype).itemsize
    bytes_per_pixel = C * itemsize + 4               # logits + int32 target
    if block_bytes is None:
        block_bytes = _default_block_bytes()

    logits = outputs.reshape(N, C, S)                # free reshape of NCHW
    tgt = targets.reshape(N, 1, S).astype(jnp.int32)

    if S % 128 == 0:
        # dense path: leading-axis class reduction, (TR, 128) dense epilogue
        SR = S // 128
        tr = max(8, (block_bytes // (bytes_per_pixel * 128)) // 8 * 8)
        tr = min(tr, SR)                             # == SR or a multiple of 8
        num_tiles = pl.cdiv(SR, tr)
        pix_per_block = tr * 128
        inputs = (logits.reshape(N, C, SR, 128), tgt.reshape(N, 1, SR, 128))
        in_specs = [
            pl.BlockSpec((1, C, tr, 128), lambda n, s: (n, 0, s, 0)),
            pl.BlockSpec((1, 1, tr, 128), lambda n, s: (n, 0, s, 0)),
        ]
    else:
        # ragged fallback: keep lane-dense (N, C, S) layout, no HBM pad pass
        padded_s = pl.cdiv(S, 128) * 128
        tile_s = max(128, (block_bytes // bytes_per_pixel) // 128 * 128)
        tile_s = min(tile_s, padded_s)
        num_tiles = pl.cdiv(S, tile_s)
        pix_per_block = tile_s
        inputs = (logits, tgt)
        in_specs = [
            pl.BlockSpec((1, C, tile_s), lambda n, s: (n, 0, s)),
            pl.BlockSpec((1, 1, tile_s), lambda n, s: (n, 0, s)),
        ]

    needs_mask = (num_tiles * pix_per_block) != S

    kernel = functools.partial(_ce2d_kernel, n_valid=S,
                               pix_per_block=pix_per_block,
                               needs_mask=needs_mask)

    per_block = pix_per_block * bytes_per_pixel
    vmem_limit = int(max(32 * 1024 * 1024,
                         min(48 * 1024 * 1024,
                             2 * per_block + 8 * 1024 * 1024)))

    per_tile = pl.pallas_call(
        kernel,
        out_shape=jax.ShapeDtypeStruct((N, num_tiles, 1, 1), jnp.float32),
        grid_spec=pltpu.PrefetchScalarGridSpec(
            num_scalar_prefetch=0,
            grid=(N, num_tiles),
            in_specs=in_specs,
            out_specs=pl.BlockSpec((1, 1, 1, 1), lambda n, s: (n, s, 0, 0)),
        ),
        compiler_params=pltpu.CompilerParams(
            # independent per-tile partial sums: both axes parallel, so v7x's
            # two TensorCores stay busy even when N == 1
            dimension_semantics=("parallel", "parallel"),
            vmem_limit_bytes=vmem_limit,
        ),
    )(*inputs)

    # size_average=True: mean over all N*H*W pixels.
    return jnp.sum(per_tile) / (N * S)


def _reference(outputs, targets):
    # pure-JAX reference: mean over pixels of -log_softmax(outputs)[target]
    logp = jax.nn.log_softmax(outputs.astype(jnp.float32), axis=1)  # (N,C,H,W)
    t = targets.astype(jnp.int32)
    picked = jnp.take_along_axis(logp, t[:, None, :, :], axis=1)[:, 0]
    return -jnp.mean(picked)


if __name__ == "__main__":
    key = jax.random.PRNGKey(0)
    k1, k2, k3, k4, k5, k6 = jax.random.split(key, 6)

    # primary shape implied by the module: batch=2, classes=4, spatial 16x16
    # (S = 256 is a multiple of 128 -> dense retiled path)
    N, C, H, W = 2, 4, 16, 16
    outputs = jax.random.normal(k1, (N, C, H, W), dtype=jnp.float32)
    targets = jax.random.randint(k2, (N, H, W), 0, C, dtype=jnp.int32)
    loss = jax.block_until_ready(cross_entropy_loss_2d(outputs, targets))
    ref = jax.block_until_ready(_reference(outputs, targets))
    assert jnp.allclose(loss, ref, atol=1e-5, rtol=1e-5), (loss, ref)

    # ragged spatial size (not a multiple of 128) exercises the lane-layout
    # fallback path and the last-step-only tail mask.
    N2, C2, H2, W2 = 2, 4, 10, 13
    outputs2 = jax.random.normal(k3, (N2, C2, H2, W2), dtype=jnp.float32)
    targets2 = jax.random.randint(k4, (N2, H2, W2), 0, C2, dtype=jnp.int32)
    loss2 = jax.block_until_ready(cross_entropy_loss_2d(outputs2, targets2))
    ref2 = jax.block_until_ready(_reference(outputs2, targets2))
    assert jnp.allclose(loss2, ref2, atol=1e-5, rtol=1e-5), (loss2, ref2)

    # (1, 1, H, W) 4-D target path (the module's view() branch), N == 1
    N3, C3, H3, W3 = 1, 4, 32, 32
    outputs3 = jax.random.normal(k5, (N3, C3, H3, W3), dtype=jnp.float32)
    targets3 = jax.random.randint(k6, (1, 1, H3, W3), 0, C3, dtype=jnp.int32)
    loss3 = jax.block_until_ready(cross_entropy_loss_2d(outputs3, targets3))
    ref3 = jax.block_until_ready(_reference(outputs3, targets3.reshape(1, H3, W3)))
    assert jnp.allclose(loss3, ref3, atol=1e-5, rtol=1e-5), (loss3, ref3)

    print("KERNEL_OK")
</pallas_src>

<mosaic_0001>
module attributes {stable_mosaic.version = 11 : i64} {
  func.func @_ce2d_kernel(%arg0: i32, %arg1: i32, %arg2: memref<1x4x2x128xf32, #tpu.memory_space<vmem>>, %arg3: memref<1x1x2x128xi32, #tpu.memory_space<vmem>>, %arg4: memref<1x1x1x1xf32, #tpu.memory_space<vmem>>) attributes {dimension_semantics = [#tpu.dimension_semantics<parallel>, #tpu.dimension_semantics<parallel>], iteration_bounds = array<i64: 2, 1>, scalar_prefetch = 0 : i64, scratch_operands = 0 : i64, tpu.core_type = #tpu.core_type<tc>, window_params = [{transform_indices = @transform_0, window_bounds = array<i64: 1, 4, 2, 128>}, {transform_indices = @transform_1, window_bounds = array<i64: 1, 1, 2, 128>}, {transform_indices = @transform_2, window_bounds = array<i64: 1, 1, 1, 1>}]} {
    %c0 = arith.constant 0 : index
    %c0_0 = arith.constant 0 : index
    %c0_1 = arith.constant 0 : index
    %c0_2 = arith.constant 0 : index
    %0 = vector.load %arg2[%c0, %c0_0, %c0_1, %c0_2] : memref<1x4x2x128xf32, #tpu.memory_space<vmem>>, vector<1x4x2x128xf32>
    %1 = vector.shape_cast %0 : vector<1x4x2x128xf32> to vector<4x2x128xf32>
    %c0_3 = arith.constant 0 : index
    %c0_4 = arith.constant 0 : index
    %c0_5 = arith.constant 0 : index
    %c0_6 = arith.constant 0 : index
    %2 = vector.load %arg3[%c0_3, %c0_4, %c0_5, %c0_6] : memref<1x1x2x128xi32, #tpu.memory_space<vmem>>, vector<1x1x2x128xi32>
    %3 = vector.shape_cast %2 : vector<1x1x2x128xi32> to vector<1x2x128xi32>
    %cst = arith.constant dense<0xFF800000> : vector<2x128xf32>
    %4 = vector.multi_reduction <maximumf>, %1, %cst [0] : vector<4x2x128xf32> to vector<2x128xf32>
    %5 = vector.shape_cast %4 : vector<2x128xf32> to vector<1x2x128xf32>
    %6 = vector.broadcast %5 : vector<1x2x128xf32> to vector<4x2x128xf32>
    %7 = arith.subf %1, %6 : vector<4x2x128xf32>
    %8 = math.exp %7 : vector<4x2x128xf32>
    %cst_7 = arith.constant dense<0.000000e+00> : vector<2x128xf32>
    %9 = vector.multi_reduction <add>, %8, %cst_7 [0] : vector<4x2x128xf32> to vector<2x128xf32>
    %10 = vector.shape_cast %9 : vector<2x128xf32> to vector<1x2x128xf32>
    %11 = math.log %10 : vector<1x2x128xf32>
    %12 = arith.addf %11, %5 : vector<1x2x128xf32>
    %13 = tpu.iota {dimensions = array<i32: 0>} : vector<4x2x128xi32>
    %14 = vector.broadcast %3 : vector<1x2x128xi32> to vector<4x2x128xi32>
    %15 = arith.cmpi eq, %13, %14 : vector<4x2x128xi32>
    %cst_8 = arith.constant 0.000000e+00 : f32
    %16 = vector.broadcast %cst_8 : f32 to vector<4x2x128xf32>
    %17 = arith.select %15, %1, %16 : vector<4x2x128xi1>, vector<4x2x128xf32>
    %cst_9 = arith.constant dense<0.000000e+00> : vector<2x128xf32>
    %18 = vector.multi_reduction <add>, %17, %cst_9 [0] : vector<4x2x128xf32> to vector<2x128xf32>
    %19 = vector.shape_cast %18 : vector<2x128xf32> to vector<1x2x128xf32>
    %20 = arith.subf %12, %19 : vector<1x2x128xf32>
    %21 = vector.shape_cast %20 : vector<1x2x128xf32> to vector<1x1x2x128xf32>
    %cst_10 = arith.constant dense<0.000000e+00> : vector<1xf32>
    %22 = vector.multi_reduction <add>, %21, %cst_10 [1, 2, 3] : vector<1x1x2x128xf32> to vector<1xf32>
    %23 = vector.shape_cast %22 : vector<1xf32> to vector<1x1x1x1xf32>
    %24 = vector.extract %23[0, 0, 0, 0] : f32 from vector<1x1x1x1xf32>
    %25 = vector.broadcast %24 : f32 to vector<1x1x1x1xf32>
    %c0_11 = arith.constant 0 : index
    %c0_12 = arith.constant 0 : index
    %c0_13 = arith.constant 0 : index
    %c0_14 = arith.constant 0 : index
    %26 = vector.load %arg4[%c0_11, %c0_12, %c0_13, %c0_14] : memref<1x1x1x1xf32, #tpu.memory_space<vmem>>, vector<1x1x1x1xf32>
    tpu.vector_store %arg4[%c0_11, %c0_12, %c0_13, %c0_14], %25 {strides = array<i32>} : memref<1x1x1x1xf32, #tpu.memory_space<vmem>>, vector<1x1x1x1xf32>,
    return
  }
  func.func @transform_0(%arg0: i32, %arg1: i32) -> (i32, i32, i32, i32) {
    %c0_i32 = arith.constant 0 : i32
    %c0_i32_0 = arith.constant 0 : i32
    %c0_i32_1 = arith.constant 0 : i32
    return %arg0, %c0_i32, %arg1, %c0_i32_0 : i32, i32, i32, i32
  }
  func.func @transform_1(%arg0: i32, %arg1: i32) -> (i32, i32, i32, i32) {
    %c0_i32 = arith.constant 0 : i32
    %c0_i32_0 = arith.constant 0 : i32
    %c0_i32_1 = arith.constant 0 : i32
    return %arg0, %c0_i32, %arg1, %c0_i32_0 : i32, i32, i32, i32
  }
  func.func @transform_2(%arg0: i32, %arg1: i32) -> (i32, i32, i32, i32) {
    %c0_i32 = arith.constant 0 : i32
    %c0_i32_0 = arith.constant 0 : i32
    %c0_i32_1 = arith.constant 0 : i32
    return %arg0, %arg1, %c0_i32, %c0_i32_0 : i32, i32, i32, i32
  }
}

</mosaic_0001>

<bundles_post_ra>
// kernel: tpu_custom_call.1
= control target key start
LH: loop header
LB: loop body
LE: loop exit
PB: predicated region body
PF: predicated region fallthrough
CT: control target
= control target key end

     0   :  { %7 = vsyncpa [#allocation3], 0  ;;  %s750_s0 = inlined_call_operand.hbm [shape: f32[2,4,2,128], index: 0, kind: input, shape index: {}]   ;;  %s751_s1 = inlined_call_operand.hbm [shape: s32[2,1,2,128], index: 1, kind: input, shape index: {}]   ;;  %s752_s2 = inlined_call_operand.vmem [shape: f32[2,1,1,1], index: 2, kind: output, shape index: {}]  }
   0x1   :  { %9 = vsyncpa [#allocation3 + $0x1], 0 }
   0x2   :  { %10 = vsyncpa [#allocation5], 0 }
   0x3   :  { %12 = vsyncpa [#allocation5 + $0x1], 0  ;;  %s610_s9 = smov 0   ;;  %s612_s10 = smov 0  }
   0x4   :  { %s614_s11 = smov 0   ;;  %s616_s12 = smov 0  }
   0x5   :  { %s618_s13 = smov 0   ;;  %s620_s14 = smov 0  }
   0x6 LB: > { %s390_s15 = sadd.s32 4294967295, %s589_s14   ;;  %s30_s16 = sadd.s32 1, %s585_s13  ;;  %s589_s14 = sphi %s620_s14, %s18_s14   ;;  %s585_s13 = sphi %s618_s13, %s761_s13   ;;  %s581_s12 = sphi %s616_s12, %s760_s12   ;;  %s577_s11 = sphi %s614_s11, %s759_s11   ;;  %s573_s10 = sphi %s612_s10, %s758_s10   ;;  %s569_s9 = sphi %s610_s9, %s757_s9  }
   0x7   : > { %p32_p0 = scmp.ge.s32.totalorder %s30_s16, 2  ;;  %s39_s17 = sadd.s32 1, %s577_s11 }
   0x8   : > { %p46_p1 = scmp.ne.s32.totalorder %s577_s11, %s573_s10  ;;  %p47_p2 = scmp.eq.s32.totalorder %s589_s14, 0 }
   0x9   : > { %s763_s16 = smov (%p32_p0, %s30_s16), 0  ;;  %p52_p4 = scmp.ne.s32.totalorder %s573_s10, %s569_s9 }
   0xa   : > { %p646_p3 = por %p47_p2, %p46_p1  ;;  %s34_s19 = ssub.s32 %s585_s13, %s763_s16 }
   0xb   : > { %p53_p5 = scmp.eq.s32.totalorder %s390_s15, 0  ;;  %p37_p6 = scmp.eq.s32.totalorder %s34_s19, 0 }
   0xc   : > { %p418_p8 = scmp.lt.s32.totalorder %s589_s14, 2  ;;  %s662_s22 = sand.u32 1, %s577_s11  }
   0xd   : > { %p653_p7 = por %p53_p5, %p52_p4  ;;  %s404_s23 = sshll.u32 %s585_s13, 7 }
   0xe   : > { %s659_s21 = scalar_select %p37_p6, %s577_s11, %s39_s17  }
   0xf   : > { %s394_s24 = sshll.u32 %s662_s22, 3  ;;  %s143_s27 = scalar_lea.hbm %s750_s0, %s404_s23 }
  0x10   : > { %s136_s28 = scalar_lea.vmem [#allocation2], %s394_s24  ;;  %p671_p9 = pnand %p418_p8, %p646_p3 }
  0x11   : > { %s144_s29 = sshll.u32 %s136_s28, 4  ;;  %s133_s3 = scalar_lea.sflag [#allocation3], %s662_s22  ;;  %s145_s29 = int_to_ptr.vmem [resolvable:$true] %s144_s29 }
  0x12   : > { %p481_p10 = pneg %p671_p9  ;;  %s492_s4 = scalar_lea.vmem %s145_s29, 128 }
  0x13   : > { %p493_p11 = scmp.ne.s32.totalorder %s145_s29, %s492_s4  ;;  %s591_s5 = smov [#allocation2]  }
  0x14   : > { %s497_s6 = sshll.u32 %s591_s5, 4  ;;  %s498_s6 = int_to_ptr.vmem [resolvable:$false] %s497_s6 }
  0x15   : > { %p495_p12 = pnand %p493_p11, %p481_p10  ;;  %s499_s7 = scalar_lea.vmem %s498_s6, 256 }
  0x16   : > { %p500_p0 = scmp.lt.s32.totalorder %s145_s29, %s498_s6  ;;  %p501_p1 = scmp.lt.s32.totalorder %s499_s7, %s492_s4 }
  0x17   : > { %p496_p13 = pneg %p495_p12 }
  0x18   : > { %p502_p2 = por %p501_p1, %p500_p0 }
  0x1a   : > { %p503_p3 = pnand %p502_p2, %p496_p13 }
  0x1c   : > { %506 = shalt.err (!%p503_p3)
}
  0x1d   : > { %s592_s8 = smov 32   ;;  %s593_s9 = smov 2  }
  0x1e   : > { %414 = dma.hbm_to_vmem [thread:$0]  (!%p671_p9), %s143_s27, 128, %s145_s29, %s133_s3, %s592_s8, %s592_s8, %s593_s9  }
  0x1f   : > { %p399_p4 = scmp.ge.s32.totalorder %s589_s14, 1  ;;  %p171_p5 = scmp.lt.s32.totalorder %s589_s14, 3 }
  0x20   : > { %s397_s15 = sshll.u32 %s662_s22, 1  ;;  %s398_s18 = sshll.u32 %s585_s13, 5 }
  0x21   : > { %p686_p6 = pnand %p399_p4, %p171_p5  ;;  %s158_s19 = scalar_lea.vmem [#allocation4], %s397_s15 }
  0x22   : > { %s166_s23 = sshll.u32 %s158_s19, 4  ;;  %s164_s26 = scalar_lea.hbm %s751_s1, %s398_s18  ;;  %s167_s23 = int_to_ptr.vmem [resolvable:$true] %s166_s23 }
  0x23   : > { %s155_s28 = scalar_lea.sflag [#allocation5], %s662_s22  ;;  %s520_s4 = scalar_lea.vmem %s167_s23, 32 }
  0x24   : > { %p521_p8 = scmp.ne.s32.totalorder %s167_s23, %s520_s4  ;;  %s594_s27 = smov [#allocation4]  }
  0x25   : > { %s525_s29 = sshll.u32 %s594_s27, 4  ;;  %s526_s29 = int_to_ptr.vmem [resolvable:$false] %s525_s29 }
  0x26   : > { %p523_p11 = pnand %p521_p8, %p481_p10  ;;  %s527_s3 = scalar_lea.vmem %s526_s29, 64 }
  0x27   : > { %p528_p13 = scmp.lt.s32.totalorder %s167_s23, %s526_s29  ;;  %p529_p0 = scmp.lt.s32.totalorder %s527_s3, %s520_s4 }
  0x28   : > { %p524_p12 = pneg %p523_p11 }
  0x29   : > { %p530_p1 = por %p529_p0, %p528_p13 }
  0x2b   : > { %p531_p2 = pnand %p530_p1, %p524_p12 }
  0x2d   : > { %534 = shalt.err (!%p531_p2)
}
  0x2e   : > { %417 = dma.hbm_to_vmem [thread:$0]  (!%p671_p9), %s164_s26, 32, %s167_s23, %s155_s28  }
  0x2f   : > { %175 = sbr.rel (%p686_p6) target bundleno = 312 (0x138), region = 28  ;;  %s177_s22 = sand.u32 (!%p686_p6), 1, %s573_s10  }
  0x30   : > { %s400_s5 = sshll.u32 (!%p686_p6), %s177_s22, 3  ;;  %s178_s6 = scalar_lea.sflag (!%p686_p6), [#allocation3], %s177_s22 }
  0x31   : > { %s181_s7 = scalar_lea.vmem (!%p686_p6), [#allocation2], %s400_s5 }
  0x34   : > { %560 = dma.done.wait (%p653_p7), %s178_s6, 128  }
  0x35   : > { %562 = vsyncadd (%p653_p7), %s178_s6, 4294967168  ;;  %s401_s8 = sshll.u32 %s177_s22, 1  ;;  %s187_s9 = scalar_lea.sflag [#allocation5], %s177_s22 }
  0x36   : > { %s707_s15 = scalar_lea.vmem [#allocation4], %s401_s8 }
  0x37   : > { %564 = dma.done.wait (%p653_p7), %s187_s9, 32  }
  0x38   : > { %566 = vsyncadd (%p653_p7), %s187_s9, 4294967264  ;;  %vm228_vm0 = vcmask 1041408   ;;  %v223_v0 = vld [vmem:[%s181_s7] sm:$0x3]  ;;  %v224_v1 = vld [vmem:[%s181_s7 + $0x2] sm:$0x3] }
  0x39   : > { %v225_v2 = vld [vmem:[%s181_s7 + $0x4] sm:$0x3]  ;;  %v226_v3 = vld [vmem:[%s181_s7 + $0x6] sm:$0x3]  ;;  %v229_v4 = vsel %vm228_vm0, %v223_v0, -inf  ;;  %v230_v5 = vsel %vm228_vm0, %v224_v1, -inf }
  0x3a   : > { %v231_v6 = vsel %vm228_vm0, %v225_v2, -inf  ;;  %v232_v7 = vsel %vm228_vm0, %v226_v3, -inf  ;;  %v233_v8 = vmax.f32 %v229_v4, %v230_v5  ;;  %v227_v25 = vld [vmem:[%s707_s15] sm:$0x3]  ;;  %p217_p7 = scmp.lt.s32.totalorder %s581_s12, 1  ;;  %vm285_vm5 = vcmask 0  }
  0x3b   : > { %v234_v9 = vmax.f32 %v231_v6, %v232_v7  ;;  %vm258_vm1 = vcmp.eq.s32.totalorder %v227_v25, 0  ;;  %vm259_vm2 = vcmp.eq.s32.totalorder %v227_v25, 1  ;;  %vm260_vm3 = vcmp.eq.s32.totalorder %v227_v25, 2 }
  0x3c   : > { %v262_v31 = vsel %vm258_vm1, %v223_v0, 0.0  ;;  %v263_v32 = vsel %vm259_vm2, %v224_v1, 0.0  ;;  %v264_v35 = vsel %vm260_vm3, %v225_v2, 0.0  ;;  %vm261_vm4 = vcmp.eq.s32.totalorder %v227_v25, 3  ;;  %s765_s12 = smov (!%p217_p7, %s581_s12), 1 }
  0x3d   : > { %v235_v10 = vmax.f32 %v233_v8, %v234_v9  ;;  %v266_v33 = vsel %vm228_vm0, %v262_v31, 0.0  ;;  %v267_v34 = vsel %vm228_vm0, %v263_v32, 0.0  ;;  %v269_v37 = vsel %vm228_vm0, %v264_v35, 0.0  ;;  %s222_s17 = scalar_lea.vmem %s752_s2, %s765_s12 }
  0x3e   : > { %v268_v36 = vadd.f32 %v267_v34, %v266_v33  ;;  %v265_v38 = vsel %vm261_vm4, %v226_v3, 0.0 }
  0x3f   : > { %v236_v11 = vsub.f32 %v223_v0, %v235_v10  ;;  %v237_v12 = vsub.f32 %v224_v1, %v235_v10  ;;  %v238_v13 = vsub.f32 %v225_v2, %v235_v10  ;;  %v239_v14 = vsub.f32 %v226_v3, %v235_v10 }
  0x40   : > { %v270_v39 = vadd.f32 %v269_v37, %v268_v36  ;;  %v271_v40 = vsel %vm228_vm0, %v265_v38, 0.0 }
  0x41   : > { %v240_v15 = vmul.f32 1.442695, %v236_v11  ;;  %v242_v16 = vmul.f32 1.442695, %v237_v12  ;;  %v244_v17 = vmul.f32 1.442695, %v238_v13 }
  0x42   : > { %v246_v18 = vmul.f32 1.442695, %v239_v14  ;;  %v272_v43 = vadd.f32 %v271_v40, %v270_v39 }
  0x43   : > { %469 = vpow2.f32 %v240_v15 }
  0x44   : > { %471 = vpow2.f32 %v242_v16 }
  0x45   : > { %473 = vpow2.f32 %v244_v17 }
  0x46   : > { %475 = vpow2.f32 %v246_v18 }
  0x50   : > { %v470_v19 = vpop.eup %469 }
  0x51   : > { %v472_v20 = vpop.eup %471  ;;  %v248_v21 = vsel %vm228_vm0, %v470_v19, 0.0 }
  0x52   : > { %v474_v22 = vpop.eup %473  ;;  %v249_v23 = vsel %vm228_vm0, %v472_v20, 0.0 }
  0x53   : > { %v476_v24 = vpop.eup %475  ;;  %v250_v26 = vadd.f32 %v249_v23, %v248_v21  ;;  %v251_v27 = vsel %vm228_vm0, %v474_v22, 0.0 }
  0x54   : > { %v253_v28 = vsel %vm228_vm0, %v476_v24, 0.0 }
  0x55   : > { %v252_v29 = vadd.f32 %v251_v27, %v250_v26 }
  0x57   : > { %v254_v30 = vadd.f32 %v253_v28, %v252_v29 }
  0x59   : > { %477 = vlog2.f32 %v254_v30 }
  0x66   : > { %v478_v41 = vpop.eup %477 }
  0x67   : > { %v256_v42 = vmul.f32 0.6931472, %v478_v41 }
  0x69   : > { %v257_v44 = vadd.f32 %v256_v42, %v235_v10 }
  0x6b   : > { %v273_v45 = vsub.f32 %v257_v44, %v272_v43 }
  0x6d   : > { %v274_v46 = vsel %vm228_vm0, %v273_v45, 0.0 }
  0x6e   : > { %275 = vadd.xlane.f32.xlu0 %v274_v46 }
  0xf7   : > { %v276_v47 = vpop.xlane.xlu0 %275 }
  0xf8   : > { %v277_v48 = vrot.slane %v276_v47, 4 }
  0xfa   : > { %v278_v49 = vadd.f32 %v277_v48, %v276_v47 }
  0xfc   : > { %v279_v50 = vrot.slane %v278_v49, 2 }
  0xfe   : > { %v280_v51 = vadd.f32 %v279_v50, %v278_v49 }
 0x100   : > { %v281_v52 = vrot.slane %v280_v51, 1 }
 0x102   : > { %v282_v53 = vadd.f32 %v281_v52, %v280_v51 }
 0x104   : > { %405 = vpush %v282_v53 }
 0x135   : > { %s406_s18 = spop %405 }
 0x136   : > { %v284_v54 = vstv %s406_s18 }
 0x137   : > { %286 = vst.msk [vmem:[%s222_s17] sm:$0x1] %vm285_vm5, %v284_v54 }
 0x138 PF: > { %s18_s14 = sadd.s32 1, %s589_s14   ;;  %s757_s9 = smov %s573_s10 }
 0x139   : > { %p15_p9 = scmp.ge.s32.totalorder %s18_s14, 4   ;;  %s758_s10 = smov %s577_s11 }
 0x13a   : > { %s759_s11 = smov %s659_s21  ;;  %s760_s12 = smov %s585_s13 }
 0x13b   : > { %s761_s13 = smov %s763_s16  ;;  %17 = sbr.rel (!%p15_p9) target bundleno = 6 (0x6), region = 81 }
 0x140   :  { %310 = vsyncpa [#allocation3], 1 }
 0x141   :  { %312 = vsyncpa [#allocation3 + $0x1], 1 }
 0x142   :  { %313 = vsyncpa [#allocation5], 1 }
 0x143   :  { %315 = vsyncpa [#allocation5 + $0x1], 1 }

</bundles_post_ra>
